<compile_context>
chip_gen: v6e
topology: v6e:2x2x1
jax: 0.10.0
libtpu: 0.0.40
codegen_flags: <defaults>
</compile_context>

<pallas_src>
import functools

import jax
import jax.numpy as jnp
from jax.experimental import pallas as pl
from jax.experimental.pallas import tpu as pltpu

_LN_EPS = 1e-5


def _patch_embed_kernel(x_ref, w_ref, b_ref, g_ref, beta_ref, o_ref):
    """One (batch, column-tile) grid step.

    x_ref:    (Kp, TM) bf16  patch columns for this tile (channels-major rows)
    w_ref:    (E, Kp)  bf16  flattened Conv3d weight (VMEM-resident)
    b_ref:    (E, 1)   f32   conv bias
    g_ref:    (E, 1)   f32   LayerNorm gamma
    beta_ref: (E, 1)   f32   LayerNorm beta
    o_ref:    (E, TM)        output tile (already in NCDHW column order)
    """
    # (1,p,p)/(1,p,p) Conv3d == matmul over flattened patches.
    # bf16 x bf16 operands, f32 MXU accumulation.
    h = jnp.dot(w_ref[...], x_ref[...], preferred_element_type=jnp.float32)
    h = h + b_ref[...]
    # LayerNorm over embed_dim (axis 0 here); all elementwise math in f32.
    mu = jnp.mean(h, axis=0, keepdims=True)
    d = h - mu
    var = jnp.mean(d * d, axis=0, keepdims=True)
    y = d * jax.lax.rsqrt(var + _LN_EPS) * g_ref[...] + beta_ref[...]
    o_ref[...] = y.astype(o_ref.dtype)


def _choose_tile_m(mb, batch, k_rows, e_dim, in_bytes, out_bytes):
    """Pick the column (lane) tile size.

    Policy:
      * Always a multiple of 128 (or the full axis if mb <= 128): full-lane
        unmasked stores; a non-dividing last tile is clipped by the block
        DMA, so no pad/slice HBM round trips.
      * Capped so double-buffered in+out blocks use <= ~8 MiB VMEM (safe on
        v7x's 64 MiB physical VMEM at large embed dims).
      * Small enough that batch * num_tiles >= ~8 grid steps, so the software
        pipeline overlaps DMAs and both v7x TensorCores get >= 4 steps each.
    """
    if mb <= 128:
        return mb
    vmem_block_budget = 8 * 1024 * 1024
    per_lane = 2 * (k_rows * in_bytes + e_dim * out_bytes)   # double-buffered
    cap = max(128, min(2048, vmem_block_budget // per_lane))
    want_tiles = max(1, -(-8 // batch))                      # ceil(8 / batch)
    target = max(128, min(cap, mb // want_tiles))
    return max(128, (target // 128) * 128)


@functools.partial(jax.jit, static_argnames=("patch_size", "out_dtype"))
def patch_embed_forward(x, conv_w, conv_b, ln_g, ln_b, *, patch_size,
                        out_dtype=None):
    """PatchEmbed forward (std=False path).

    x:      (B, C, T, H, W), H % p == 0, W % p == 0
    conv_w: (E, C, 1, p, p) Conv3d weight (kernel (1,p,p), stride (1,p,p))
    conv_b: (E,)
    ln_g, ln_b: (E,) LayerNorm affine parameters
    returns (B, E, T, H//p, W//p) in out_dtype (default: x.dtype)
    """
    p = patch_size
    B, C, T, H, W = x.shape
    E = conv_w.shape[0]
    assert H % p == 0 and W % p == 0, "spatial dims must be divisible by patch"
    Hp, Wp = H // p, W // p
    Mb = T * Hp * Wp              # columns (= patches) per batch element
    K = C * p * p                 # flattened patch length
    out_dtype = x.dtype if out_dtype is None else jnp.dtype(out_dtype)
    out_bytes = jnp.dtype(out_dtype).itemsize

    # im2col, channels-major rows (c, ph, pw), columns (t, hp, wp); the
    # convert-to-bf16 fuses into the same XLA transpose pass, and
    # allow_input_fusion below additionally lets XLA fuse this producer into
    # the Pallas call.  Row order matches conv_w.reshape(E, K); column order
    # matches flatten(2), so the kernel output needs NO transpose afterwards.
    patches = x.reshape(B, C, T, Hp, p, Wp, p)
    patches = patches.transpose(0, 1, 4, 6, 2, 3, 5).reshape(B, K, Mb)
    patches = patches.astype(jnp.bfloat16)
    w2d = conv_w.reshape(E, K).astype(jnp.bfloat16)

    # Pad K to a multiple of 16 (bf16 sublane packing); zero rows/cols leave
    # the matmul unchanged.  (K = C*p*p is already a multiple of 16 for the
    # common in_chans=3, patch=4 config, so this is usually a no-op.)
    Kp = -(-K // 16) * 16
    if Kp != K:
        patches = jnp.pad(patches, ((0, 0), (0, Kp - K), (0, 0)))
        w2d = jnp.pad(w2d, ((0, 0), (0, Kp - K)))

    b_col = conv_b.astype(jnp.float32).reshape(E, 1)
    g_col = ln_g.astype(jnp.float32).reshape(E, 1)
    beta_col = ln_b.astype(jnp.float32).reshape(E, 1)

    tile_m = _choose_tile_m(Mb, B, Kp, E, 2, out_bytes)
    num_tiles = pl.cdiv(Mb, tile_m)
    grid = (B, num_tiles)

    block_bytes = (2 * tile_m * (Kp * 2 + E * out_bytes)
                   + E * Kp * 2 + 3 * E * 4)
    vmem_limit = int(min(64 * 1024 * 1024,
                         max(16 * 1024 * 1024, 2 * block_bytes)))

    cost = pl.CostEstimate(
        flops=int(2 * B * Mb * Kp * E + 10 * B * Mb * E),
        transcendentals=int(B * Mb),                       # rsqrt per column
        bytes_accessed=int(B * Kp * Mb * 2 + B * E * Mb * out_bytes
                           + E * Kp * 2 + 3 * E * 4),
    )

    out = pl.pallas_call(
        _patch_embed_kernel,
        out_shape=jax.ShapeDtypeStruct((B, E, Mb), out_dtype),
        grid=grid,
        in_specs=[
            # patch columns: lane-dense (lanes = tile_m)
            pl.BlockSpec((None, Kp, tile_m), lambda b, j: (b, 0, j)),
            # weights / bias / LN params stay resident in VMEM
            pl.BlockSpec((E, Kp), lambda b, j: (0, 0)),
            pl.BlockSpec((E, 1), lambda b, j: (0, 0)),
            pl.BlockSpec((E, 1), lambda b, j: (0, 0)),
            pl.BlockSpec((E, 1), lambda b, j: (0, 0)),
        ],
        # lane-dense output block (lanes = tile_m, not the channel count)
        out_specs=pl.BlockSpec((None, E, tile_m), lambda b, j: (b, 0, j)),
        compiler_params=pltpu.CompilerParams(
            dimension_semantics=("parallel", "parallel"),
            vmem_limit_bytes=vmem_limit,
            allow_input_fusion=[True, False, False, False, False]),
        cost_estimate=cost,
    )(patches, w2d, b_col, g_col, beta_col)

    # (B, E, T*Hp*Wp) is already NCDHW order -> pure reshape, no transpose.
    return out.reshape(B, E, T, Hp, Wp)


if __name__ == "__main__":
    # Small shapes consistent with the module: batch=2, in_chans=3,
    # embed_dim=128, T=8, H=W=32, patch_size=4  ->  8x8 patches per frame.
    B, C, T, H, W = 2, 3, 8, 32, 32
    p = 4
    E = 128

    key = jax.random.PRNGKey(0)
    kx, kw, kb, kg, kbe = jax.random.split(key, 5)
    x = jax.random.normal(kx, (B, C, T, H, W), dtype=jnp.float32)
    conv_w = 0.1 * jax.random.normal(kw, (E, C, 1, p, p), dtype=jnp.float32)
    conv_b = 0.1 * jax.random.normal(kb, (E,), dtype=jnp.float32)
    ln_g = 1.0 + 0.1 * jax.random.normal(kg, (E,), dtype=jnp.float32)
    ln_b = 0.1 * jax.random.normal(kbe, (E,), dtype=jnp.float32)

    y = patch_embed_forward(x, conv_w, conv_b, ln_g, ln_b, patch_size=p)
    jax.block_until_ready(y)
    assert y.shape == (B, E, T, H // p, W // p)

    def reference(xr, wr):
        # Plain-JAX reference: Conv3d (1,p,p)/(1,p,p) + bias, LayerNorm, layout.
        conv = jax.lax.conv_general_dilated(
            xr, wr, window_strides=(1, p, p), padding="VALID",
            dimension_numbers=("NCDHW", "OIDHW", "NCDHW"),
            precision=jax.lax.Precision.HIGHEST)
        conv = conv + conv_b.reshape(1, E, 1, 1, 1)
        Bc, Ec, Tc, Hc, Wc = conv.shape
        seq = conv.reshape(Bc, Ec, -1).transpose(0, 2, 1)        # (B, M, E)
        mu = seq.mean(-1, keepdims=True)
        var = ((seq - mu) ** 2).mean(-1, keepdims=True)
        ln = (seq - mu) / jnp.sqrt(var + _LN_EPS) * ln_g + ln_b
        return ln.reshape(Bc, Tc, Hc, Wc, Ec).transpose(0, 4, 1, 2, 3)

    # Tight check against a precision-matched reference (conv operands rounded
    # to bf16, f32 accumulation + f32 LN) -- verifies the im2col / matmul /
    # bias / LayerNorm / layout logic exactly.
    x_r = x.astype(jnp.bfloat16).astype(jnp.float32)
    w_r = conv_w.astype(jnp.bfloat16).astype(jnp.float32)
    y_ref_bf16 = reference(x_r, w_r)
    err_tight = float(jnp.max(jnp.abs(y - y_ref_bf16)))
    assert jnp.allclose(y, y_ref_bf16, atol=1e-3, rtol=1e-3), err_tight

    # Loose check against the full-f32 HIGHEST-precision reference: the
    # explicitly chosen tolerance for running the patch projection with bf16
    # MXU operands (errors are dominated by operand rounding, ~1e-2).
    y_ref_f32 = reference(x, conv_w)
    err_loose = float(jnp.max(jnp.abs(y - y_ref_f32)))
    assert jnp.allclose(y, y_ref_f32, atol=5e-2, rtol=5e-2), err_loose

    print("KERNEL_OK")
</pallas_src>

<mosaic_0001>
module attributes {stable_mosaic.version = 11 : i64} {
  func.func @_patch_embed_kernel(%arg0: i32, %arg1: i32, %arg2: memref<1x48x128xbf16, #tpu.memory_space<vmem>>, %arg3: memref<128x48xbf16, #tpu.memory_space<vmem>>, %arg4: memref<128x1xf32, #tpu.memory_space<vmem>>, %arg5: memref<128x1xf32, #tpu.memory_space<vmem>>, %arg6: memref<128x1xf32, #tpu.memory_space<vmem>>, %arg7: memref<1x128x128xf32, #tpu.memory_space<vmem>>) attributes {dimension_semantics = [#tpu.dimension_semantics<parallel>, #tpu.dimension_semantics<parallel>], iteration_bounds = array<i64: 2, 4>, scalar_prefetch = 0 : i64, scratch_operands = 0 : i64, tpu.core_type = #tpu.core_type<tc>, window_params = [{transform_indices = @transform_0, window_bounds = array<i64: 1, 48, 128>}, {pipeline_mode = #tpu.pipeline_mode<synchronous>, transform_indices = @transform_1, window_bounds = array<i64: 128, 48>}, {pipeline_mode = #tpu.pipeline_mode<synchronous>, transform_indices = @transform_2, window_bounds = array<i64: 128, 1>}, {pipeline_mode = #tpu.pipeline_mode<synchronous>, transform_indices = @transform_3, window_bounds = array<i64: 128, 1>}, {pipeline_mode = #tpu.pipeline_mode<synchronous>, transform_indices = @transform_4, window_bounds = array<i64: 128, 1>}, {transform_indices = @transform_5, window_bounds = array<i64: 1, 128, 128>}]} {
    %c0 = arith.constant 0 : index
    %c0_0 = arith.constant 0 : index
    %0 = vector.load %arg3[%c0, %c0_0] : memref<128x48xbf16, #tpu.memory_space<vmem>>, vector<128x48xbf16>
    %c0_1 = arith.constant 0 : index
    %c0_2 = arith.constant 0 : index
    %c0_3 = arith.constant 0 : index
    %1 = vector.load %arg2[%c0_1, %c0_2, %c0_3] : memref<1x48x128xbf16, #tpu.memory_space<vmem>>, vector<1x48x128xbf16>
    %2 = vector.shape_cast %1 : vector<1x48x128xbf16> to vector<48x128xbf16>
    %cst = arith.constant dense<0.000000e+00> : vector<128x128xf32>
    %3 = tpu.matmul %0, %2, %cst {dimension_numbers = #tpu.dot_dimension_numbers<[1], [0], [0], [1], [0, 0, 1, 1], [], []>} : vector<128x48xbf16>, vector<48x128xbf16>, vector<128x128xf32> -> vector<128x128xf32>
    %c0_4 = arith.constant 0 : index
    %c0_5 = arith.constant 0 : index
    %4 = vector.load %arg4[%c0_4, %c0_5] : memref<128x1xf32, #tpu.memory_space<vmem>>, vector<128x1xf32>
    %5 = vector.broadcast %4 : vector<128x1xf32> to vector<128x128xf32>
    %6 = arith.addf %3, %5 : vector<128x128xf32>
    %cst_6 = arith.constant dense<0.000000e+00> : vector<128xf32>
    %7 = vector.multi_reduction <add>, %6, %cst_6 [0] : vector<128x128xf32> to vector<128xf32>
    %8 = vector.shape_cast %7 : vector<128xf32> to vector<1x128xf32>
    %cst_7 = arith.constant 1.280000e+02 : f32
    %9 = vector.broadcast %cst_7 : f32 to vector<1x128xf32>
    %10 = arith.divf %8, %9 : vector<1x128xf32>
    %11 = vector.broadcast %10 : vector<1x128xf32> to vector<128x128xf32>
    %12 = arith.subf %6, %11 : vector<128x128xf32>
    %13 = arith.mulf %12, %12 : vector<128x128xf32>
    %cst_8 = arith.constant dense<0.000000e+00> : vector<128xf32>
    %14 = vector.multi_reduction <add>, %13, %cst_8 [0] : vector<128x128xf32> to vector<128xf32>
    %15 = vector.shape_cast %14 : vector<128xf32> to vector<1x128xf32>
    %cst_9 = arith.constant 1.280000e+02 : f32
    %16 = vector.broadcast %cst_9 : f32 to vector<1x128xf32>
    %17 = arith.divf %15, %16 : vector<1x128xf32>
    %cst_10 = arith.constant 9.99999974E-6 : f32
    %18 = vector.broadcast %cst_10 : f32 to vector<1x128xf32>
    %19 = arith.addf %17, %18 : vector<1x128xf32>
    %20 = math.rsqrt %19 : vector<1x128xf32>
    %21 = vector.broadcast %20 : vector<1x128xf32> to vector<128x128xf32>
    %22 = arith.mulf %12, %21 : vector<128x128xf32>
    %c0_11 = arith.constant 0 : index
    %c0_12 = arith.constant 0 : index
    %23 = vector.load %arg5[%c0_11, %c0_12] : memref<128x1xf32, #tpu.memory_space<vmem>>, vector<128x1xf32>
    %24 = vector.broadcast %23 : vector<128x1xf32> to vector<128x128xf32>
    %25 = arith.mulf %22, %24 : vector<128x128xf32>
    %c0_13 = arith.constant 0 : index
    %c0_14 = arith.constant 0 : index
    %26 = vector.load %arg6[%c0_13, %c0_14] : memref<128x1xf32, #tpu.memory_space<vmem>>, vector<128x1xf32>
    %27 = vector.broadcast %26 : vector<128x1xf32> to vector<128x128xf32>
    %28 = arith.addf %25, %27 : vector<128x128xf32>
    %c0_15 = arith.constant 0 : index
    %c0_16 = arith.constant 0 : index
    %c0_17 = arith.constant 0 : index
    %29 = vector.load %arg7[%c0_15, %c0_16, %c0_17] : memref<1x128x128xf32, #tpu.memory_space<vmem>>, vector<1x128x128xf32>
    %30 = vector.shape_cast %29 : vector<1x128x128xf32> to vector<128x128xf32>
    %31 = vector.shape_cast %28 : vector<128x128xf32> to vector<1x128x128xf32>
    tpu.vector_store %arg7[%c0_15, %c0_16, %c0_17], %31 {strides = array<i32>} : memref<1x128x128xf32, #tpu.memory_space<vmem>>, vector<1x128x128xf32>,
    return
  }
  func.func @transform_0(%arg0: i32, %arg1: i32) -> (i32, i32, i32) {
    %c0_i32 = arith.constant 0 : i32
    %c0_i32_0 = arith.constant 0 : i32
    return %arg0, %c0_i32, %arg1 : i32, i32, i32
  }
  func.func @transform_1(%arg0: i32, %arg1: i32) -> (i32, i32) {
    %c0_i32 = arith.constant 0 : i32
    %c0_i32_0 = arith.constant 0 : i32
    %c0_i32_1 = arith.constant 0 : i32
    return %c0_i32, %c0_i32_0 : i32, i32
  }
  func.func @transform_2(%arg0: i32, %arg1: i32) -> (i32, i32) {
    %c0_i32 = arith.constant 0 : i32
    %c0_i32_0 = arith.constant 0 : i32
    %c0_i32_1 = arith.constant 0 : i32
    return %c0_i32, %c0_i32_0 : i32, i32
  }
  func.func @transform_3(%arg0: i32, %arg1: i32) -> (i32, i32) {
    %c0_i32 = arith.constant 0 : i32
    %c0_i32_0 = arith.constant 0 : i32
    %c0_i32_1 = arith.constant 0 : i32
    return %c0_i32, %c0_i32_0 : i32, i32
  }
  func.func @transform_4(%arg0: i32, %arg1: i32) -> (i32, i32) {
    %c0_i32 = arith.constant 0 : i32
    %c0_i32_0 = arith.constant 0 : i32
    %c0_i32_1 = arith.constant 0 : i32
    return %c0_i32, %c0_i32_0 : i32, i32
  }
  func.func @transform_5(%arg0: i32, %arg1: i32) -> (i32, i32, i32) {
    %c0_i32 = arith.constant 0 : i32
    %c0_i32_0 = arith.constant 0 : i32
    return %arg0, %c0_i32, %arg1 : i32, i32, i32
  }
}

</mosaic_0001>

<bundles_post_ra>
// kernel: patch_embed_forward.1
= control target key start
LH: loop header
LB: loop body
LE: loop exit
PB: predicated region body
PF: predicated region fallthrough
CT: control target
= control target key end

     0   :  { %s1342_s18 = smov 0   ;;  %s1344_s19 = smov 0   ;;  %s1768_s0 = inlined_call_operand.vmem [shape: bf16[2,48,512], index: 0, kind: input, shape index: {}]   ;;  %s1769_s1 = inlined_call_operand.vmem [shape: bf16[128,48], index: 1, kind: input, shape index: {}]   ;;  %s1770_s2 = inlined_call_operand.vmem [shape: f32[128,1], index: 2, kind: input, shape index: {}]   ;;  %s1771_s3 = inlined_call_operand.vmem [shape: f32[128,1], index: 3, kind: input, shape index: {}]   ;;  %s1772_s4 = inlined_call_operand.vmem [shape: f32[128,1], index: 4, kind: input, shape index: {}]   ;;  %s1773_s5 = inlined_call_operand.vmem [shape: f32[2,128,512], index: 5, kind: output, shape index: {}]  }
   0x1   :  { %s1346_s20 = smov 0   ;;  %s1348_s21 = smov 0  }
   0x2   :  { %s1350_s22 = smov 0   ;;  %s1352_s23 = smov 0  }
   0x3   :  { %s1354_s24 = smov 0  }
   0x4 LB: > { %s24_s25 = sadd.s32 1, %s1301_s22  ;;  %s27_s26 = sadd.s32 1, %s1305_s23  ;;  %s1309_s24 = sphi %s1354_s24, %s15_s24   ;;  %s1305_s23 = sphi %s1352_s23, %s1780_s23   ;;  %s1301_s22 = sphi %s1350_s22, %s1779_s22   ;;  %s1297_s21 = sphi %s1348_s21, %s1778_s21   ;;  %s1293_s20 = sphi %s1346_s20, %s1777_s20   ;;  %s1289_s19 = sphi %s1344_s19, %s1776_s19   ;;  %s1285_s18 = sphi %s1342_s18, %s1775_s18  }
   0x5   : > { %p25_p0 = scmp.ge.s32.totalorder %s24_s25, 4  ;;  %s1110_s27 = sadd.s32 4294967295, %s1309_s24  }
   0x6   : > { %p43_p1 = scmp.ne.s32.totalorder %s1289_s19, %s1285_s18  ;;  %p44_p2 = scmp.eq.s32.totalorder %s1309_s24, 0 }
   0x7   : > { %s1782_s25 = smov (%p25_p0, %s24_s25), 0  ;;  %s1784_s26 = smov (!%p25_p0, %s27_s26), %s1305_s23 }
   0x8   : > { %p29_p3 = scmp.ge.s32.totalorder %s1784_s26, 2  ;;  %p159_p4 = scmp.eq.s32.totalorder %s1110_s27, 7 }
   0x9   : > { %s32_s28 = ssub.s32 %s1301_s22, %s1782_s25  ;;  %p45_p5 = por %p44_p2, %p43_p1 }
   0xa   : > { %s1786_s26 = smov (%p29_p3, %s1784_s26), 0  ;;  %p1390_p6 = por %p159_p4, %p43_p1 }
   0xb   : > { %s31_s30 = ssub.s32 %s1305_s23, %s1786_s26  ;;  %s36_s7 = sadd.s32 1, %s1289_s19 }
   0xc   : > { %s33_s6 = sor.u32 %s32_s28, %s31_s30  ;;  %p1113_p8 = scmp.ge.s32.totalorder %s1309_s24, 8 }
   0xd   : > { %p34_p7 = scmp.eq.s32.totalorder %s33_s6, 0 }
   0xe   : > { %193 = sbr.rel (%p1113_p8) target bundleno = 30 (0x1e), region = 32 }
   0xf   : > { %s1398_s8 = scalar_select %p34_p7, %s1289_s19, %s36_s7  }
  0x13   : > { %196 = sbr.rel (!%p45_p5) target bundleno = 30 (0x1e), region = 36  ;;  %s198_s9 = sand.u32 (%p45_p5), 1, %s1289_s19  }
  0x14   : > { %s1181_s10 = smul.u32 (%p45_p5), 24, %s1305_s23 }
  0x15   : > { %s1180_s11 = smul.u32 (%p45_p5), 24, %s198_s9 }
  0x16   : > { %s202_s12 = sadd.s32 (%p45_p5), %s1301_s22, %s1181_s10 }
  0x17   : > { %s1114_s13 = sshll.u32 (%p45_p5), %s202_s12, 2  ;;  %s200_s17 = scalar_lea.vmem (%p45_p5), [#allocation2], %s1180_s11 }
  0x18   : > { %s204_s16 = scalar_lea.vmem %s1768_s0, %s1114_s13 }
  0x19   : > { %v221_v0 = vld [vmem:[%s204_s16] sm:$0xf]  ;;  %v223_v1 = vld [vmem:[%s204_s16 + $0x10] sm:$0xf] }
  0x1a   : > { %v225_v2 = vld [vmem:[%s204_s16 + $0x20] sm:$0xf]  ;;  %222 = vst [vmem:[%s200_s17] sm:$0xf] %v221_v0  ;;  %224 = vst [vmem:[%s200_s17 + $0x4] sm:$0xf] %v223_v1 }
  0x1b   : > { %226 = vst [vmem:[%s200_s17 + $0x8] sm:$0xf] %v225_v2  ;;  %v227_v3 = vld [vmem:[%s204_s16 + $0x30] sm:$0xf]  ;;  %v229_v4 = vld [vmem:[%s204_s16 + $0x40] sm:$0xf] }
  0x1c   : > { %v231_v5 = vld [vmem:[%s204_s16 + $0x50] sm:$0xf]  ;;  %228 = vst [vmem:[%s200_s17 + $0xc] sm:$0xf] %v227_v3  ;;  %230 = vst [vmem:[%s200_s17 + $0x10] sm:$0xf] %v229_v4 }
  0x1d   : > { %232 = vst [vmem:[%s200_s17 + $0x14] sm:$0xf] %v231_v5 }
  0x1e PF: > { %p1115_p9 = scmp.ge.s32.totalorder %s1309_s24, 1  ;;  %p267_p10 = scmp.lt.s32.totalorder %s1309_s24, 9 }
  0x20   : > { %p268_p11 = pnand %p1115_p9, %p267_p10 }
  0x21   : > { %s274_s7 = sand.u32 (!%p268_p11), 1, %s1285_s18  }
  0x22   : > { %271 = sbr.rel (%p268_p11) target bundleno = 390 (0x186), region = 77 }
  0x23   : > { %s1182_s9 = smul.u32 (!%p268_p11), 24, %s274_s7 }
  0x25   : > { %s276_s14 = scalar_lea.vmem (!%p268_p11), [#allocation2], %s1182_s9 }
  0x27   : > { %v325_v6 = vld [vmem:[%s1770_s2 + $0x10] sm:$0xff]  ;;  %v323_v7 = vld [vmem:[%s1770_s2] sm:$0xff]  ;;  %v1311_v8 = vmov 0   ;;  %v326_v9 = vld [vmem:[%s1770_s2 + $0x18] sm:$0xff]  ;;  %vm477_vm0 = vcmask 392192  }
  0x28   : > { %1241 = vset.pattern.permute.xlu1 %v1311_v8  ;;  %1240 = vset.pattern.permute.xlu0 %v1311_v8  ;;  %v324_v10 = vld [vmem:[%s1770_s2 + $0x8] sm:$0xff]  ;;  %v327_v14 = vld [vmem:[%s1770_s2 + $0x20] sm:$0xff]  ;;  %v330_v18 = vld [vmem:[%s1770_s2 + $0x38] sm:$0xff] }
  0x29   : > { %351 = vperm.xlu1 %1241, %v325_v6   ;;  %341 = vperm.xlu0 %1240, %v323_v7   ;;  %v1242_v11 = vld [vmem:[%s276_s14 + $0x10] sm:$0xff]   ;;  %v1243_v13 = vld [vmem:[%s276_s14 + $0x8] sm:$0xff]   ;;  %v1244_v17 = vld [vmem:[%s276_s14] sm:$0xff]   ;;  %s1687_s14 = sshll.u32 %s274_s7, 7  ;;  %s1137_s7 = sshll.u32 (%p1390_p6), %s1297_s21, 6 }
  0x2a   : > { %v328_v12 = vld [vmem:[%s1770_s2 + $0x28] sm:$0xff]  ;;  %1152 = vmatprep.subr.bf16.mxu0 %v1242_v11  ;;  %1174 = vmatprep.subr.bf16.mxu1 %v1242_v11  ;;  %v1245_v15 = vld [vmem:[%s1769_s1] sm:$0xff]   ;;  %v329_v19 = vld [vmem:[%s1770_s2 + $0x30] sm:$0xff]  ;;  %s1706_s18 = scalar_lea.vmem [#allocation3], %s1687_s14  ;;  %s942_s29 = sadd.s32 (%p1390_p6), %s1293_s20, %s1137_s7 }
  0x2b   : > { %1153 = vmatpush3.bf16.msra.mxu0 %v1242_v11  ;;  %1177 = vmatpush3.bf16.msra.mxu1 %v1242_v11  ;;  %v1246_v16 = vld [vmem:[%s1769_s1 + $0x20] sm:$0xff]   ;;  %v332_v20 = vld [vmem:[%s1770_s2 + $0x48] sm:$0xff]  ;;  %v1249_v24 = vld [vmem:[%s1769_s1 + $0x10] sm:$0xff]   ;;  %s1138_s16 = sshll.u32 (%p1390_p6), %s942_s29, 3 }
  0x2c   : > { %1154 = vmatprep.subr.bf16.mxu0 %v1243_v13  ;;  %1175 = vmatprep.subr.bf16.mxu1 %v1243_v13  ;;  %v331_v21 = vld [vmem:[%s1770_s2 + $0x40] sm:$0xff]  ;;  %v1247_v22 = vld [vmem:[%s1769_s1 + $0x8] sm:$0xff]   ;;  %v1250_v25 = vld [vmem:[%s1769_s1 + $0x30] sm:$0xff]   ;;  %s944_s28 = scalar_lea.vmem (%p1390_p6), %s1773_s5, %s1138_s16 }
  0x2d   : > { %356 = vperm.xlu1 %1241, %v326_v9   ;;  %346 = vperm.xlu0 %1240, %v324_v10   ;;  %v1248_v23 = vld [vmem:[%s1769_s1 + $0x28] sm:$0xff]   ;;  %v334_v26 = vld [vmem:[%s1770_s2 + $0x58] sm:$0xff]  ;;  %v333_v27 = vld [vmem:[%s1770_s2 + $0x50] sm:$0xff] }
  0x2e   : > { %1158 = vmatprep.mubr.msk.bf16.mxu0 %vm477_vm0, %v1245_v15  ;;  %1166 = vmatprep.mubr.msk.bf16.mxu1 %vm477_vm0, %v1246_v16  ;;  %v336_v28 = vld [vmem:[%s1770_s2 + $0x68] sm:$0xff]  ;;  %v335_v29 = vld [vmem:[%s1770_s2 + $0x60] sm:$0xff]  ;;  %v1251_v30 = vld [vmem:[%s1769_s1 + $0x18] sm:$0xff]  }
  0x2f   : > { %1155 = vmatpush3.bf16.msra.mxu0 %v1243_v13  ;;  %1178 = vmatpush3.bf16.msra.mxu1 %v1243_v13  ;;  %v1252_v31 = vld [vmem:[%s1769_s1 + $0x38] sm:$0xff]   ;;  %v337_v33 = vld [vmem:[%s1770_s2 + $0x70] sm:$0xff]  ;;  %v695_v34 = vld [vmem:[%s1771_s3 + $0x8] sm:$0xff] }
  0x30   : > { %1156 = vmatprep.subr.bf16.mxu0 %v1244_v17  ;;  %1176 = vmatprep.subr.bf16.mxu1 %v1244_v17  ;;  %v338_v32 = vld [vmem:[%s1770_s2 + $0x78] sm:$0xff]  ;;  %v694_v35 = vld [vmem:[%s1771_s3] sm:$0xff]  ;;  %v696_v37 = vld [vmem:[%s1771_s3 + $0x10] sm:$0xff] }
  0x31   : > { %366 = vperm.xlu1 %1241, %v328_v12   ;;  %361 = vperm.xlu0 %1240, %v327_v14   ;;  %v697_v36 = vld [vmem:[%s1771_s3 + $0x18] sm:$0xff]  ;;  %v699_v38 = vld [vmem:[%s1771_s3 + $0x28] sm:$0xff]  ;;  %v698_v39 = vld [vmem:[%s1771_s3 + $0x20] sm:$0xff] }
  0x32   : > { %v701_v40 = vld [vmem:[%s1771_s3 + $0x38] sm:$0xff]  ;;  %v700_v41 = vld [vmem:[%s1771_s3 + $0x30] sm:$0xff]  ;;  %v703_v42 = vld [vmem:[%s1771_s3 + $0x48] sm:$0xff] }
  0x33   : > { %1157 = vmatpush3.bf16.msra.mxu0 %v1244_v17  ;;  %1179 = vmatpush3.bf16.msra.mxu1 %v1244_v17  ;;  %v702_v43 = vld [vmem:[%s1771_s3 + $0x40] sm:$0xff]  ;;  %v705_v44 = vld [vmem:[%s1771_s3 + $0x58] sm:$0xff]  ;;  %v704_v45 = vld [vmem:[%s1771_s3 + $0x50] sm:$0xff] }
  0x34   : > { %v707_v46 = vld [vmem:[%s1771_s3 + $0x68] sm:$0xff]  ;;  %v706_v47 = vld [vmem:[%s1771_s3 + $0x60] sm:$0xff]  ;;  %v709_v48 = vld [vmem:[%s1771_s3 + $0x78] sm:$0xff] }
  0x35   : > { %376 = vperm.xlu1 %1241, %v330_v18   ;;  %371 = vperm.xlu0 %1240, %v329_v19   ;;  %v708_v49 = vld [vmem:[%s1771_s3 + $0x70] sm:$0xff]  ;;  %v807_v50 = vld [vmem:[%s1772_s4 + $0x8] sm:$0xff]  ;;  %v806_v51 = vld [vmem:[%s1772_s4] sm:$0xff] }
  0x36   : > { %1159 = vmatmul.mubr.msk.bf16.vlgmr.msra.gmra.mxu0 %vm477_vm0, %v1247_v22  ;;  %1167 = vmatmul.mubr.msk.bf16.vlgmr.msra.gmra.mxu1 %vm477_vm0, %v1248_v23  ;;  %v809_v52 = vld [vmem:[%s1772_s4 + $0x18] sm:$0xff]  ;;  %v808_v53 = vld [vmem:[%s1772_s4 + $0x10] sm:$0xff]  ;;  %v811_v54 = vld [vmem:[%s1772_s4 + $0x28] sm:$0xff] }
  0x37   : > { %1162 = vmatprep.mubr.msk.bf16.mxu0 %vm477_vm0, %v1249_v24  ;;  %1170 = vmatprep.mubr.msk.bf16.mxu1 %vm477_vm0, %v1250_v25  ;;  %v810_v55 = vld [vmem:[%s1772_s4 + $0x20] sm:$0xff]  ;;  %v813_v56 = vld [vmem:[%s1772_s4 + $0x38] sm:$0xff]  ;;  %v812_v57 = vld [vmem:[%s1772_s4 + $0x30] sm:$0xff] }
  0x38   : > { %v815_v58 = vld [vmem:[%s1772_s4 + $0x48] sm:$0xff]  ;;  %v814_v59 = vld [vmem:[%s1772_s4 + $0x40] sm:$0xff]  ;;  %v817_v60 = vld [vmem:[%s1772_s4 + $0x58] sm:$0xff] }
  0x39   : > { %386 = vperm.xlu1 %1241, %v332_v20   ;;  %381 = vperm.xlu0 %1240, %v331_v21   ;;  %v816_v61 = vld [vmem:[%s1772_s4 + $0x50] sm:$0xff]  ;;  %v819_v62 = vld [vmem:[%s1772_s4 + $0x68] sm:$0xff]  ;;  %v818_v63 = vld [vmem:[%s1772_s4 + $0x60] sm:$0xff] }
  0x3a   : > { %v821_v0 = vld [vmem:[%s1772_s4 + $0x78] sm:$0xff]  ;;  %v820_v1 = vld [vmem:[%s1772_s4 + $0x70] sm:$0xff] }
  0x3d   : > { %396 = vperm.xlu1 %1241, %v334_v26   ;;  %391 = vperm.xlu0 %1240, %v333_v27  }
  0x3e   : > { %1163 = vmatmul.mubr.msk.bf16.gmra.mxu0 %vm477_vm0, %v1251_v30  ;;  %1171 = vmatmul.mubr.msk.bf16.gmra.mxu1 %vm477_vm0, %v1252_v31 }
  0x41   : > { %406 = vperm.xlu1 %1241, %v336_v28   ;;  %401 = vperm.xlu0 %1240, %v335_v29  }
  0x45   : > { %416 = vperm.xlu1 %1241, %v338_v32   ;;  %411 = vperm.xlu0 %1240, %v337_v33  }
  0x49   : > { %717 = vperm.xlu1 %1241, %v695_v34   ;;  %712 = vperm.xlu0 %1240, %v694_v35  }
  0x4d   : > { %727 = vperm.xlu1 %1241, %v697_v36   ;;  %722 = vperm.xlu0 %1240, %v696_v37  }
  0x51   : > { %737 = vperm.xlu1 %1241, %v699_v38   ;;  %732 = vperm.xlu0 %1240, %v698_v39  }
  0x55   : > { %747 = vperm.xlu1 %1241, %v701_v40   ;;  %742 = vperm.xlu0 %1240, %v700_v41  }
  0x59   : > { %757 = vperm.xlu1 %1241, %v703_v42   ;;  %752 = vperm.xlu0 %1240, %v702_v43  }
  0x5d   : > { %767 = vperm.xlu1 %1241, %v705_v44   ;;  %762 = vperm.xlu0 %1240, %v704_v45  }
  0x61   : > { %777 = vperm.xlu1 %1241, %v707_v46   ;;  %772 = vperm.xlu0 %1240, %v706_v47  }
  0x65   : > { %787 = vperm.xlu1 %1241, %v709_v48   ;;  %782 = vperm.xlu0 %1240, %v708_v49  }
  0x69   : > { %829 = vperm.xlu1 %1241, %v807_v50   ;;  %824 = vperm.xlu0 %1240, %v806_v51  }
  0x6d   : > { %839 = vperm.xlu1 %1241, %v809_v52   ;;  %834 = vperm.xlu0 %1240, %v808_v53  }
  0x71   : > { %849 = vperm.xlu1 %1241, %v811_v54   ;;  %844 = vperm.xlu0 %1240, %v810_v55  }
  0x75   : > { %859 = vperm.xlu1 %1241, %v813_v56   ;;  %854 = vperm.xlu0 %1240, %v812_v57  }
  0x79   : > { %869 = vperm.xlu1 %1241, %v815_v58   ;;  %864 = vperm.xlu0 %1240, %v814_v59  }
  0x7d   : > { %879 = vperm.xlu1 %1241, %v817_v60   ;;  %874 = vperm.xlu0 %1240, %v816_v61  }
  0x81   : > { %889 = vperm.xlu1 %1241, %v819_v62   ;;  %884 = vperm.xlu0 %1240, %v818_v63  }
  0x85   : > { %899 = vperm.xlu1 %1241, %v821_v0   ;;  %894 = vperm.xlu0 %1240, %v820_v1  }
  0xa4   : > { %v342_v2 = vpop.permute.xlu0 %341  ;;  %v352_v3 = vpop.permute.xlu1 %351 }
  0xa8   : > { %v347_v4 = vpop.permute.xlu0 %346  ;;  %v357_v5 = vpop.permute.xlu1 %356 }
  0xac   : > { %v362_v8 = vpop.permute.xlu0 %361  ;;  %v367_v10 = vpop.permute.xlu1 %366 }
  0xb0   : > { %v372_v14 = vpop.permute.xlu0 %371  ;;  %v377_v21 = vpop.permute.xlu1 %376 }
  0xb4   : > { %v382_v29 = vpop.permute.xlu0 %381  ;;  %v387_v33 = vpop.permute.xlu1 %386 }
  0xb8   : > { %v392_v39 = vpop.permute.xlu0 %391  ;;  %v397_v43 = vpop.permute.xlu1 %396 }
  0xbc   : > { %v402_v49 = vpop.permute.xlu0 %401  ;;  %v407_v52 = vpop.permute.xlu1 %406 }
  0xc0   : > { %v412_v58 = vpop.permute.xlu0 %411  ;;  %v417_v61 = vpop.permute.xlu1 %416 }
  0xf6   : > { %v1160_v6 = vpop.f32.mrf.mxu0  ;;  %v1168_v7 = vpop.f32.mrf.mxu1 }
  0xf7   : > { %v545_v19 = vadd.f32 %v1160_v6, %v352_v3  ;;  %v577_v47 = vadd.f32 %v1168_v7, %v392_v39  ;;  %v1605_v3 = vpop.permute.xlu0 %712 }
  0xf8   : > { %v536_v9 = vpop.f32.mrf.mxu0  ;;  %v568_v11 = vpop.f32.mrf.mxu1 }
  0xf9   : > { %v1588_v15 = vadd.f32 %v536_v9, %v342_v2  ;;  %v569_v41 = vadd.f32 %v568_v11, %v382_v29  ;;  %v1603_v2 = vpop.permute.xlu1 %717 }
  0xfa   : > { %v1161_v12 = vpop.f32.mrf.mxu0  ;;  %v1169_v17 = vpop.f32.mrf.mxu1 }
  0xfb   : > { %v548_v23 = vadd.f32 %v1161_v12, %v357_v5  ;;  %v580_v50 = vadd.f32 %v1169_v17, %v397_v43 }
  0xfc   : > { %v539_v13 = vpop.f32.mrf.mxu0  ;;  %v571_v25 = vpop.f32.mrf.mxu1 }
  0xfd   : > { %v1590_v16 = vadd.f32 %v539_v13, %v347_v4  ;;  %v572_v44 = vadd.f32 %v571_v25, %v387_v33  ;;  %v1607_v7 = vpop.permute.xlu1 %727 }
  0xfe   : > { %v1164_v18 = vpop.f32.mrf.mxu0  ;;  %v1172_v34 = vpop.f32.mrf.mxu1 }
  0xff   : > { %v599_v20 = vadd.f32 %v1590_v16, %v1588_v15  ;;  %v561_v35 = vadd.f32 %v1164_v18, %v372_v14  ;;  %v1596_v59 = vadd.f32 %v1172_v34, %v412_v58 }
 0x100   : > { %v552_v22 = vpop.f32.mrf.mxu0  ;;  %v584_v40 = vpop.f32.mrf.mxu1 }
 0x101   : > { %v600_v24 = vadd.f32 %v599_v20, %v545_v19  ;;  %v553_v27 = vadd.f32 %v552_v22, %v362_v8  ;;  %v585_v54 = vadd.f32 %v584_v40, %v402_v49  ;;  %v1609_v8 = vpop.permute.xlu0 %722  ;;  %v1611_v12 = vpop.permute.xlu1 %737 }
 0x102   : > { %v1165_v26 = vpop.f32.mrf.mxu0  ;;  %v1173_v46 = vpop.f32.mrf.mxu1 }
 0x103   : > { %v601_v28 = vadd.f32 %v600_v24, %v548_v23  ;;  %v564_v37 = vadd.f32 %v1165_v26, %v377_v21  ;;  %v1599_v62 = vadd.f32 %v1173_v46, %v417_v61 }
 0x104   : > { %v555_v30 = vpop.f32.mrf.mxu0  ;;  %v587_v53 = vpop.f32.mrf.mxu1 }
 0x105   : > { %v602_v31 = vadd.f32 %v601_v28, %v553_v27  ;;  %v556_v32 = vadd.f32 %v555_v30, %v367_v10  ;;  %v1594_v56 = vadd.f32 %v587_v53, %v407_v52  ;;  %v1613_v13 = vpop.permute.xlu0 %732  ;;  %v1627_v22 = vpop.permute.xlu1 %747 }
 0x107   : > { %v603_v36 = vadd.f32 %v602_v31, %v556_v32 }
 0x109   : > { %v604_v38 = vadd.f32 %v603_v36, %v561_v35  ;;  %v1629_v24 = vpop.permute.xlu0 %742  ;;  %v1641_v30 = vpop.permute.xlu1 %757 }
 0x10b   : > { %v605_v42 = vadd.f32 %v604_v38, %v564_v37 }
 0x10d   : > { %v606_v45 = vadd.f32 %v605_v42, %v569_v41  ;;  %v1643_v31 = vpop.permute.xlu0 %752  ;;  %v1657_v42 = vpop.permute.xlu1 %767 }
 0x10f   : > { %v607_v48 = vadd.f32 %v606_v45, %v572_v44 }
 0x111   : > { %v608_v51 = vadd.f32 %v607_v48, %v577_v47  ;;  %v1665_v53 = vpop.permute.xlu1 %777 }
 0x113   : > { %v609_v55 = vadd.f32 %v608_v51, %v580_v50 }
 0x115   : > { %v610_v57 = vadd.f32 %v609_v55, %v585_v54 }
 0x117   : > { %v611_v60 = vadd.f32 %v610_v57, %v1594_v56 }
 0x119   : > { %v612_v63 = vadd.f32 %v611_v60, %v1596_v59 }
 0x11b   : > { %v613_v0 = vadd.f32 %v612_v63, %v1599_v62 }
 0x11d   : > { %v614_v1 = vrot.slane %v613_v0, 4 }
 0x11f   : > { %v615_v4 = vadd.f32 %v614_v1, %v613_v0 }
 0x121   : > { %v616_v5 = vrot.slane %v615_v4, 2 }
 0x123   : > { %v617_v6 = vadd.f32 %v616_v5, %v615_v4  ;;  %v1671_v4 = vpop.permute.xlu1 %787 }
 0x125   : > { %v618_v9 = vrot.slane %v617_v6, 1 }
 0x127   : > { %v619_v10 = vadd.f32 %v618_v9, %v617_v6 }
 0x129   : > { %v621_v11 = vmul.f32 0.0078125, %v619_v10 }
 0x12b   : > { %v1616_v14 = vsub.f32 %v1588_v15, %v621_v11  ;;  %v1619_v17 = vsub.f32 %v1590_v16, %v621_v11  ;;  %v1621_v18 = vsub.f32 %v545_v19, %v621_v11  ;;  %v1631_v25 = vsub.f32 %v548_v23, %v621_v11 }
 0x12c   : > { %v1633_v26 = vsub.f32 %v553_v27, %v621_v11  ;;  %v1637_v19 = vsub.f32 %v556_v32, %v621_v11  ;;  %v1645_v33 = vsub.f32 %v561_v35, %v621_v11  ;;  %v1649_v34 = vsub.f32 %v564_v37, %v621_v11  ;;  %v1659_v35 = vpop.permute.xlu0 %762 }
 0x12d   : > { %v638_v20 = vmul.f32 %v1616_v14, %v1616_v14  ;;  %v639_v21 = vmul.f32 %v1619_v17, %v1619_v17  ;;  %v640_v15 = vmul.f32 %v1621_v18, %v1621_v18  ;;  %v641_v28 = vmul.f32 %v1631_v25, %v1631_v25 }
 0x12e   : > { %v642_v23 = vmul.f32 %v1633_v26, %v1633_v26  ;;  %v643_v32 = vmul.f32 %v1637_v19, %v1637_v19  ;;  %v1653_v38 = vsub.f32 %v569_v41, %v621_v11  ;;  %v644_v39 = vmul.f32 %v1645_v33, %v1645_v33 }
 0x12f   : > { %v654_v16 = vadd.f32 %v639_v21, %v638_v20  ;;  %v631_v43 = vsub.f32 %v572_v44, %v621_v11  ;;  %v645_v45 = vmul.f32 %v1649_v34, %v1649_v34  ;;  %v632_v46 = vsub.f32 %v577_v47, %v621_v11 }
 0x130   : > { %v646_v48 = vmul.f32 %v1653_v38, %v1653_v38  ;;  %v633_v41 = vsub.f32 %v580_v50, %v621_v11  ;;  %v1667_v55 = vpop.permute.xlu0 %772  ;;  %v634_v57 = vsub.f32 %v585_v54, %v621_v11  ;;  %v635_v44 = vsub.f32 %v1594_v56, %v621_v11 }
 0x131   : > { %v655_v29 = vadd.f32 %v654_v16, %v640_v15  ;;  %v647_v51 = vmul.f32 %v631_v43, %v631_v43  ;;  %v648_v58 = vmul.f32 %v632_v46, %v632_v46  ;;  %v636_v47 = vsub.f32 %v1596_v59, %v621_v11  ;;  %v830_v15 = vpop.permute.xlu1 %829 }
 0x132   : > { %v649_v61 = vmul.f32 %v633_v41, %v633_v41  ;;  %v650_v0 = vmul.f32 %v634_v57, %v634_v57  ;;  %v637_v5 = vsub.f32 %v1599_v62, %v621_v11  ;;  %v651_v6 = vmul.f32 %v635_v44, %v635_v44 }
 0x133   : > { %v656_v27 = vadd.f32 %v655_v29, %v641_v28  ;;  %v652_v10 = vmul.f32 %v636_v47, %v636_v47 }
 0x134   : > { %v1673_v50 = vpop.permute.xlu0 %782  ;;  %v653_v20 = vmul.f32 %v637_v5, %v637_v5 }
 0x135   : > { %v657_v36 = vadd.f32 %v656_v27, %v642_v23  ;;  %v840_v59 = vpop.permute.xlu1 %839 }
 0x137   : > { %v658_v40 = vadd.f32 %v657_v36, %v643_v32 }
 0x138   : > { %v825_v56 = vpop.permute.xlu0 %824 }
 0x139   : > { %v659_v37 = vadd.f32 %v658_v40, %v644_v39  ;;  %v850_v39 = vpop.permute.xlu1 %849 }
 0x13b   : > { %v660_v49 = vadd.f32 %v659_v37, %v645_v45 }
 0x13c   : > { %v835_v23 = vpop.permute.xlu0 %834 }
 0x13d   : > { %v661_v52 = vadd.f32 %v660_v49, %v646_v48  ;;  %v860_v37 = vpop.permute.xlu1 %859 }
 0x13f   : > { %v662_v60 = vadd.f32 %v661_v52, %v647_v51 }
 0x140   : > { %v845_v40 = vpop.permute.xlu0 %844 }
 0x141   : > { %v663_v63 = vadd.f32 %v662_v60, %v648_v58  ;;  %v870_v49 = vpop.permute.xlu1 %869 }
 0x143   : > { %v664_v1 = vadd.f32 %v663_v63, %v649_v61 }
 0x144   : > { %v855_v48 = vpop.permute.xlu0 %854 }
 0x145   : > { %v665_v9 = vadd.f32 %v664_v1, %v650_v0  ;;  %v880_v52 = vpop.permute.xlu1 %879 }
 0x147   : > { %v666_v54 = vadd.f32 %v665_v9, %v651_v6 }
 0x148   : > { %v865_v51 = vpop.permute.xlu0 %864 }
 0x149   : > { %v667_v21 = vadd.f32 %v666_v54, %v652_v10 }
 0x14b   : > { %v668_v16 = vadd.f32 %v667_v21, %v653_v20 }
 0x14c   : > { %v875_v58 = vpop.permute.xlu0 %874 }
 0x14d   : > { %v669_v28 = vrot.slane %v668_v16, 4 }
 0x14f   : > { %v670_v29 = vadd.f32 %v669_v28, %v668_v16 }
 0x151   : > { %v671_v27 = vrot.slane %v670_v29, 2 }
 0x153   : > { %v672_v32 = vadd.f32 %v671_v27, %v670_v29 }
 0x155   : > { %v673_v36 = vrot.slane %v672_v32, 1 }
 0x157   : > { %v674_v45 = vadd.f32 %v673_v36, %v672_v32 }
 0x159   : > { %v675_v62 = vmul.f32 0.0078125, %v674_v45 }
 0x15b   : > { %v676_v11 = vadd.f32 1e-05, %v675_v62 }
 0x15d   : > { %1253 = vrsqrt.f32 %v676_v11 }
 0x16a   : > { %v1254_v60 = vpop.eup %1253 }
 0x16b   : > { %v678_v61 = vmul.f32 %v1254_v60, %v1616_v14  ;;  %v679_v63 = vmul.f32 %v1254_v60, %v1619_v17  ;;  %v680_v0 = vmul.f32 %v1254_v60, %v1621_v18  ;;  %v681_v1 = vmul.f32 %v1254_v60, %v1631_v25  ;;  %v890_v18 = vpop.permute.xlu1 %889  ;;  %v885_v25 = vpop.permute.xlu0 %884 }
 0x16c   : > { %v682_v6 = vmul.f32 %v1254_v60, %v1633_v26  ;;  %v683_v9 = vmul.f32 %v1254_v60, %v1637_v19  ;;  %v684_v10 = vmul.f32 %v1254_v60, %v1645_v33  ;;  %v685_v54 = vmul.f32 %v1254_v60, %v1649_v34 }
 0x16d   : > { %v686_v20 = vmul.f32 %v1254_v60, %v1653_v38  ;;  %v687_v21 = vmul.f32 %v1254_v60, %v631_v43  ;;  %v688_v16 = vmul.f32 %v1254_v60, %v632_v46  ;;  %v689_v14 = vmul.f32 %v1254_v60, %v633_v41 }
 0x16e   : > { %v690_v28 = vmul.f32 %v1254_v60, %v634_v57  ;;  %v691_v29 = vmul.f32 %v1254_v60, %v635_v44  ;;  %v692_v17 = vmul.f32 %v1254_v60, %v636_v47  ;;  %v693_v27 = vmul.f32 %v1254_v60, %v637_v5 }
 0x16f   : > { %v790_v26 = vmul.f32 %v1605_v3, %v678_v61  ;;  %v791_v19 = vmul.f32 %v1603_v2, %v679_v63  ;;  %v792_v33 = vmul.f32 %v1609_v8, %v680_v0  ;;  %v793_v34 = vmul.f32 %v1607_v7, %v681_v1  ;;  %v895_v45 = vpop.permute.xlu0 %894 }
 0x170   : > { %v794_v38 = vmul.f32 %v1613_v13, %v682_v6  ;;  %v795_v43 = vmul.f32 %v1611_v12, %v683_v9  ;;  %v796_v46 = vmul.f32 %v1629_v24, %v684_v10  ;;  %v797_v41 = vmul.f32 %v1627_v22, %v685_v54 }
 0x171   : > { %v798_v57 = vmul.f32 %v1643_v31, %v686_v20  ;;  %v799_v44 = vmul.f32 %v1641_v30, %v687_v21  ;;  %v800_v3 = vmul.f32 %v1659_v35, %v688_v16  ;;  %v801_v2 = vmul.f32 %v1657_v42, %v689_v14  ;;  %v900_v35 = vpop.permute.xlu1 %899 }
 0x172   : > { %v802_v8 = vmul.f32 %v1667_v55, %v690_v28  ;;  %v803_v7 = vmul.f32 %v1665_v53, %v691_v29  ;;  %v804_v13 = vmul.f32 %v1673_v50, %v692_v17  ;;  %v805_v12 = vmul.f32 %v1671_v4, %v693_v27 }
 0x173   : > { %v902_v24 = vadd.f32 %v825_v56, %v790_v26  ;;  %v903_v47 = vadd.f32 %v830_v15, %v791_v19  ;;  %v904_v22 = vadd.f32 %v835_v23, %v792_v33  ;;  %v905_v5 = vadd.f32 %v840_v59, %v793_v34 }
 0x174   : > { %v906_v31 = vadd.f32 %v845_v40, %v794_v38  ;;  %v907_v32 = vadd.f32 %v850_v39, %v795_v43  ;;  %v908_v30 = vadd.f32 %v855_v48, %v796_v46  ;;  %v909_v36 = vadd.f32 %v860_v37, %v797_v41 }
 0x175   : > { %v910_v42 = vadd.f32 %v865_v51, %v798_v57  ;;  %v911_v62 = vadd.f32 %v870_v49, %v799_v44  ;;  %v912_v55 = vadd.f32 %v875_v58, %v800_v3  ;;  %v913_v11 = vadd.f32 %v880_v52, %v801_v2  ;;  %918 = vst [vmem:[%s1706_s18] sm:$0xff] %v902_v24 }
 0x176   : > { %919 = vst [vmem:[%s1706_s18 + $0x8] sm:$0xff] %v903_v47  ;;  %920 = vst [vmem:[%s1706_s18 + $0x10] sm:$0xff] %v904_v22  ;;  %v914_v53 = vadd.f32 %v885_v25, %v802_v8  ;;  %v915_v4 = vadd.f32 %v890_v18, %v803_v7  ;;  %v916_v50 = vadd.f32 %v895_v45, %v804_v13 }
 0x177   : > { %921 = vst [vmem:[%s1706_s18 + $0x18] sm:$0xff] %v905_v5  ;;  %v917_v15 = vadd.f32 %v900_v35, %v805_v12  ;;  %922 = vst [vmem:[%s1706_s18 + $0x20] sm:$0xff] %v906_v31 }
 0x178   : > { %923 = vst [vmem:[%s1706_s18 + $0x28] sm:$0xff] %v907_v32  ;;  %924 = vst [vmem:[%s1706_s18 + $0x30] sm:$0xff] %v908_v30 }
 0x179   : > { %925 = vst [vmem:[%s1706_s18 + $0x38] sm:$0xff] %v909_v36  ;;  %926 = vst [vmem:[%s1706_s18 + $0x40] sm:$0xff] %v910_v42  ;;  %940 = sbr.rel (!%p1390_p6) target bundleno = 390 (0x186), region = 85 }
 0x17a   : > { %927 = vst [vmem:[%s1706_s18 + $0x48] sm:$0xff] %v911_v62  ;;  %928 = vst [vmem:[%s1706_s18 + $0x50] sm:$0xff] %v912_v55 }
 0x17b   : > { %929 = vst [vmem:[%s1706_s18 + $0x58] sm:$0xff] %v913_v11  ;;  %930 = vst [vmem:[%s1706_s18 + $0x60] sm:$0xff] %v914_v53 }
 0x17c   : > { %931 = vst [vmem:[%s1706_s18 + $0x68] sm:$0xff] %v915_v4  ;;  %932 = vst [vmem:[%s1706_s18 + $0x70] sm:$0xff] %v916_v50  ;;  %v1003_v56 = vld [vmem:[%s1706_s18] sm:$0xff] (%p1390_p6) }
 0x17d   : > { %933 = vst [vmem:[%s1706_s18 + $0x78] sm:$0xff] %v917_v15  ;;  %v1005_v59 = vld [vmem:[%s1706_s18 + $0x8] sm:$0xff] (%p1390_p6)  ;;  %v1007_v23 = vld [vmem:[%s1706_s18 + $0x10] sm:$0xff] (%p1390_p6)  ;;  %1004 = vst [vmem:[%s944_s28] sm:$0xff] (%p1390_p6), %v1003_v56 }
 0x17e   : > { %v1009_v39 = vld [vmem:[%s1706_s18 + $0x18] sm:$0xff]  ;;  %v1011_v40 = vld [vmem:[%s1706_s18 + $0x20] sm:$0xff]  ;;  %1006 = vst [vmem:[%s944_s28 + $0x20] sm:$0xff] %v1005_v59  ;;  %1008 = vst [vmem:[%s944_s28 + $0x40] sm:$0xff] %v1007_v23 }
 0x17f   : > { %v1013_v37 = vld [vmem:[%s1706_s18 + $0x28] sm:$0xff]  ;;  %v1015_v48 = vld [vmem:[%s1706_s18 + $0x30] sm:$0xff]  ;;  %1010 = vst [vmem:[%s944_s28 + $0x60] sm:$0xff] %v1009_v39  ;;  %1012 = vst [vmem:[%s944_s28 + $0x80] sm:$0xff] %v1011_v40 }
 0x180   : > { %v1017_v49 = vld [vmem:[%s1706_s18 + $0x38] sm:$0xff]  ;;  %v1019_v51 = vld [vmem:[%s1706_s18 + $0x40] sm:$0xff]  ;;  %1014 = vst [vmem:[%s944_s28 + $0xa0] sm:$0xff] %v1013_v37  ;;  %1016 = vst [vmem:[%s944_s28 + $0xc0] sm:$0xff] %v1015_v48 }
 0x181   : > { %v1021_v52 = vld [vmem:[%s1706_s18 + $0x48] sm:$0xff]  ;;  %v1023_v58 = vld [vmem:[%s1706_s18 + $0x50] sm:$0xff]  ;;  %1018 = vst [vmem:[%s944_s28 + $0xe0] sm:$0xff] %v1017_v49  ;;  %1020 = vst [vmem:[%s944_s28 + $0x100] sm:$0xff] %v1019_v51 }
 0x182   : > { %v1025_v60 = vld [vmem:[%s1706_s18 + $0x58] sm:$0xff]  ;;  %1022 = vst [vmem:[%s944_s28 + $0x120] sm:$0xff] %v1021_v52  ;;  %1024 = vst [vmem:[%s944_s28 + $0x140] sm:$0xff] %v1023_v58  ;;  %v1027_v61 = vld [vmem:[%s1706_s18 + $0x60] sm:$0xff] }
 0x183   : > { %1026 = vst [vmem:[%s944_s28 + $0x160] sm:$0xff] %v1025_v60  ;;  %v1029_v63 = vld [vmem:[%s1706_s18 + $0x68] sm:$0xff]  ;;  %v1031_v0 = vld [vmem:[%s1706_s18 + $0x70] sm:$0xff]  ;;  %1028 = vst [vmem:[%s944_s28 + $0x180] sm:$0xff] %v1027_v61 }
 0x184   : > { %1030 = vst [vmem:[%s944_s28 + $0x1a0] sm:$0xff] %v1029_v63  ;;  %1032 = vst [vmem:[%s944_s28 + $0x1c0] sm:$0xff] %v1031_v0  ;;  %v1033_v1 = vld [vmem:[%s1706_s18 + $0x78] sm:$0xff] }
 0x185   : > { %1034 = vst [vmem:[%s944_s28 + $0x1e0] sm:$0xff] %v1033_v1 }
 0x186 PF: > { %s15_s24 = sadd.s32 1, %s1309_s24   ;;  %s1775_s18 = smov %s1289_s19 }
 0x187   : > { %p12_p12 = scmp.ge.s32.totalorder %s15_s24, 10   ;;  %s1776_s19 = smov %s1398_s8 }
 0x188   : > { %s1777_s20 = smov %s1301_s22  ;;  %s1778_s21 = smov %s1305_s23 }
 0x189   : > { %s1779_s22 = smov %s1782_s25  ;;  %s1780_s23 = smov %s1786_s26 }
 0x18a   :  { %14 = sbr.rel (!%p12_p12) target bundleno = 4 (0x4), region = 154 }

</bundles_post_ra>
